<compile_context>
chip_gen: v7x
topology: tpu7x:2x2x1
jax: 0.10.0
libtpu: 0.0.40
codegen_flags: <defaults>
</compile_context>

<pallas_src>
import functools

import jax
import jax.numpy as jnp
from jax import lax
from jax.experimental import pallas as pl
from jax.experimental.pallas import tpu as pltpu

C_IN = 3        # RGB channels
C_SUB = 8       # RGB padded to one f32 sublane group (not 128 lanes)
C_TRUNK = 1536  # EfficientNet-B3 feature channels
C_OUT = 512     # conv1x1 / FiLM channels


def _round_up(x, m):
    return ((x + m - 1) // m) * m


# ----------------------------------------------------------------------------
# Fused kernel: spatial running-sum -> (last tile) mean -> folded projection
#               -> FiLM scale/shift
# ----------------------------------------------------------------------------
def _fused_encoder_kernel(x_ref, w_ref, m1_ref, a_ref, o_ref, acc_ref, *, inv_hw):
    """Grid = (B, n_k); axis 1 is the spatial reduction ("arbitrary").

    x_ref  : (1, C_SUB, hw_tile) f32  pooled image tile (channels on sublanes)
    w_ref  : (C_SUB, C_OUT)      f32  folded (stem @ conv1x1) weight (resident)
    m1_ref : (1, 1, C_OUT)       f32  1 + FiLM multiplicative term (precomputed)
    a_ref  : (1, 1, C_OUT)       f32  FiLM additive term (precomputed)
    o_ref  : (1, 1, C_OUT)       f32  pooled encoder output
    acc_ref: (C_SUB, hw_tile)    f32  running spatial sum (VMEM scratch)
    """
    k = pl.program_id(1)

    @pl.when(k == 0)
    def _():
        acc_ref[...] = jnp.zeros_like(acc_ref)

    # Pure VPU elementwise accumulation; zero-padded HW rows are sum-neutral.
    acc_ref[...] += x_ref[0]

    @pl.when(k == pl.num_programs(1) - 1)
    def _():
        # Per-channel spatial mean, then the folded trunk+conv1x1 projection
        # (tiny: done once per batch row, VPU/XLU only), then FiLM.
        mean_c = jnp.sum(acc_ref[...], axis=1, keepdims=True) * inv_hw   # (C_SUB, 1)
        y = jnp.sum(w_ref[...] * mean_c, axis=0, keepdims=True)          # (1, C_OUT)
        o_ref[0] = m1_ref[0] * y + a_ref[0]


# ----------------------------------------------------------------------------
# Wrapper
# ----------------------------------------------------------------------------
def efficientnet_encoder_forward(image, context, params, *, pool=4, hw_tile_cap=8192):
    """image: (B, 3, H, W) in [0,1]; context: (B, 512). Returns (B, 512)."""
    B, C, H, W = image.shape
    assert C == C_IN, "image must be (B, 3, H, W)"
    Hf, Wf = H // pool, W // pool
    HW = Hf * Wf

    # TODO(synk): the pretrained EfficientNet-B3 trunk (resize to 300x300,
    # early-FiLM MBConv blocks, .pth checkpoint weights) cannot be reproduced
    # here; a deterministic average-pool + linear projection to 1536 channels
    # stands in for it so the conv1x1 + FiLM + pooling contract is preserved.
    x = image[:, :, :Hf * pool, :Wf * pool]
    x = x.reshape(B, C, Hf, pool, Wf, pool).mean(axis=(3, 5))       # (B, 3, Hf, Wf)
    x = x.reshape(B, C, HW)                                         # NCHW -> channels on sublanes

    # Spatial tiling: n_k lane-aligned tiles (no divisibility requirement on HW;
    # zero-padded rows are sum-neutral, inv_hw uses the true HW).
    n_k = max(1, -(-HW // hw_tile_cap))
    hw_tile = _round_up(-(-HW // n_k), 128)
    HW_pad = n_k * hw_tile
    x = jnp.pad(x, ((0, 0), (0, C_SUB - C), (0, HW_pad - HW))).astype(jnp.float32)

    hi = lax.Precision.HIGHEST
    # Fold the linear stand-in trunk projection (3->1536) and the conv1x1
    # (1536->512) into a single resident (C_SUB, C_OUT) weight in XLA (f32).
    w_comb = jnp.dot(params["w_stem"], params["w_conv"], precision=hi)     # (3, 512)
    w_comb = jnp.pad(w_comb, ((0, C_SUB - C_IN), (0, 0)))                  # (8, 512)

    # FiLM context projections: one fused Linear(512 -> 1024) in XLA; the
    # kernel receives (1 + mult) and add per batch row.
    w_film = jnp.concatenate([params["w_mult"], params["w_add"]], axis=1)  # (512, 1024)
    b_film = jnp.concatenate([params["b_mult"], params["b_add"]], axis=1)  # (1, 1024)
    film = jnp.dot(context, w_film, precision=hi) + b_film                 # (B, 1024)
    mult1 = (1.0 + film[:, :C_OUT]).reshape(B, 1, C_OUT)
    add = film[:, C_OUT:].reshape(B, 1, C_OUT)

    kernel = functools.partial(_fused_encoder_kernel, inv_hw=1.0 / HW)
    out3 = pl.pallas_call(
        kernel,
        out_shape=jax.ShapeDtypeStruct((B, 1, C_OUT), jnp.float32),
        grid=(B, n_k),
        in_specs=[
            pl.BlockSpec((1, C_SUB, hw_tile), lambda b, k: (b, 0, k)),  # image tiles
            pl.BlockSpec((C_SUB, C_OUT), lambda b, k: (0, 0)),          # folded weight (resident)
            pl.BlockSpec((1, 1, C_OUT), lambda b, k: (b, 0, 0)),        # 1 + FiLM mult
            pl.BlockSpec((1, 1, C_OUT), lambda b, k: (b, 0, 0)),        # FiLM add
        ],
        out_specs=pl.BlockSpec((1, 1, C_OUT), lambda b, k: (b, 0, 0)),
        scratch_shapes=[pltpu.VMEM((C_SUB, hw_tile), jnp.float32)],
        compiler_params=pltpu.CompilerParams(
            dimension_semantics=("parallel", "arbitrary")),
    )(x, w_comb, mult1, add)
    return out3.reshape(B, C_OUT)


if __name__ == "__main__":
    key = jax.random.PRNGKey(0)
    k_img, k_ctx, k_stem, k_conv, k_wm, k_wa, k_bm, k_ba = jax.random.split(key, 8)

    B, H, W = 2, 32, 32          # small synthetic image (real module resizes to 300)
    image = jax.random.uniform(k_img, (B, 3, H, W), jnp.float32)   # in [0, 1]
    context = jax.random.normal(k_ctx, (B, C_OUT), jnp.float32)

    params = {
        # stand-in trunk projection (RGB -> 1536 channels)
        "w_stem": jax.random.normal(k_stem, (C_IN, C_TRUNK), jnp.float32) * 0.05,
        # conv1x1: PyTorch weight is (512, 1536, 1, 1); stored transposed (1536, 512)
        "w_conv": jax.random.normal(k_conv, (C_TRUNK, C_OUT), jnp.float32) * 0.02,
        # FilmConditioning: two Linear(512 -> 512), stored as W^T and (1, 512) bias
        "w_mult": jax.random.normal(k_wm, (C_OUT, C_OUT), jnp.float32) * 0.02,
        "w_add": jax.random.normal(k_wa, (C_OUT, C_OUT), jnp.float32) * 0.02,
        "b_mult": jax.random.normal(k_bm, (1, C_OUT), jnp.float32) * 0.02,
        "b_add": jax.random.normal(k_ba, (1, C_OUT), jnp.float32) * 0.02,
    }

    out = efficientnet_encoder_forward(image, context, params)
    out = jax.block_until_ready(out)
    assert out.shape == (B, C_OUT)

    # Pure-JAX reference in the ORIGINAL module order (stub trunk feats ->
    # conv1x1 -> FiLM -> spatial mean), all f32 HIGHEST precision, to confirm
    # the mean-first / weight-folding rewrites used in the kernel.
    hi = lax.Precision.HIGHEST
    pool = 4
    Hf, Wf = H // pool, W // pool
    xp = image.reshape(B, 3, Hf, pool, Wf, pool).mean(axis=(3, 5))          # (B,3,Hf,Wf)
    xr = jnp.transpose(xp, (0, 2, 3, 1)).reshape(B, Hf * Wf, 3)             # (B,HW,3)
    feats = jnp.einsum("bpc,cf->bpf", xr, params["w_stem"], precision=hi)   # (B,HW,1536)
    y = jnp.einsum("bpf,fo->bpo", feats, params["w_conv"], precision=hi)    # (B,HW,512)
    m = jnp.dot(context, params["w_mult"], precision=hi) + params["b_mult"]
    a = jnp.dot(context, params["w_add"], precision=hi) + params["b_add"]
    z = (1.0 + m[:, None, :]) * y + a[:, None, :]
    ref = jnp.mean(z, axis=1)                                               # (B,512)

    assert jnp.allclose(out, ref, rtol=2e-3, atol=2e-3), (
        float(jnp.max(jnp.abs(out - ref))))

    print("KERNEL_OK")
</pallas_src>

<mosaic_0001>
module attributes {stable_mosaic.version = 11 : i64} {
  func.func @_fused_encoder_kernel(%arg0: i32, %arg1: i32, %arg2: memref<1x8x128xf32, #tpu.memory_space<vmem>>, %arg3: memref<8x512xf32, #tpu.memory_space<vmem>>, %arg4: memref<1x1x512xf32, #tpu.memory_space<vmem>>, %arg5: memref<1x1x512xf32, #tpu.memory_space<vmem>>, %arg6: memref<1x1x512xf32, #tpu.memory_space<vmem>>, %arg7: memref<8x128xf32, #tpu.memory_space<vmem>>) attributes {dimension_semantics = [#tpu.dimension_semantics<parallel>, #tpu.dimension_semantics<arbitrary>], iteration_bounds = array<i64: 2, 1>, scalar_prefetch = 0 : i64, scratch_operands = 1 : i64, tpu.core_type = #tpu.core_type<tc>, window_params = [{transform_indices = @transform_0, window_bounds = array<i64: 1, 8, 128>}, {pipeline_mode = #tpu.pipeline_mode<synchronous>, transform_indices = @transform_1, window_bounds = array<i64: 8, 512>}, {transform_indices = @transform_2, window_bounds = array<i64: 1, 1, 512>}, {transform_indices = @transform_3, window_bounds = array<i64: 1, 1, 512>}, {transform_indices = @transform_4, window_bounds = array<i64: 1, 1, 512>}]} {
    %c0_i32 = arith.constant 0 : i32
    %0 = arith.cmpi eq, %arg1, %c0_i32 : i32
    %1 = arith.extui %0 : i1 to i32
    %c0_i32_0 = arith.constant 0 : i32
    %2 = arith.cmpi ne, %1, %c0_i32_0 : i32
    scf.if %2 {
      %cst = arith.constant 0.000000e+00 : f32
      %11 = vector.broadcast %cst : f32 to vector<8x128xf32>
      %c0_9 = arith.constant 0 : index
      %c0_10 = arith.constant 0 : index
      %12 = vector.load %arg7[%c0_9, %c0_10] : memref<8x128xf32, #tpu.memory_space<vmem>>, vector<8x128xf32>
      tpu.vector_store %arg7[%c0_9, %c0_10], %11 {strides = array<i32>} : memref<8x128xf32, #tpu.memory_space<vmem>>, vector<8x128xf32>,
    } else {
    }
    %c0 = arith.constant 0 : index
    %c0_1 = arith.constant 0 : index
    %3 = vector.load %arg7[%c0, %c0_1] : memref<8x128xf32, #tpu.memory_space<vmem>>, vector<8x128xf32>
    %c0_2 = arith.constant 0 : index
    %c0_3 = arith.constant 0 : index
    %c0_4 = arith.constant 0 : index
    %4 = vector.load %arg2[%c0_2, %c0_3, %c0_4] : memref<1x8x128xf32, #tpu.memory_space<vmem>>, vector<1x8x128xf32>
    %5 = vector.shape_cast %4 : vector<1x8x128xf32> to vector<8x128xf32>
    %6 = arith.addf %3, %5 : vector<8x128xf32>
    %c0_5 = arith.constant 0 : index
    %c0_6 = arith.constant 0 : index
    %7 = vector.load %arg7[%c0_5, %c0_6] : memref<8x128xf32, #tpu.memory_space<vmem>>, vector<8x128xf32>
    tpu.vector_store %arg7[%c0_5, %c0_6], %6 {strides = array<i32>} : memref<8x128xf32, #tpu.memory_space<vmem>>, vector<8x128xf32>,
    %c0_i32_7 = arith.constant 0 : i32
    %8 = arith.cmpi eq, %arg1, %c0_i32_7 : i32
    %9 = arith.extui %8 : i1 to i32
    %c0_i32_8 = arith.constant 0 : i32
    %10 = arith.cmpi ne, %9, %c0_i32_8 : i32
    scf.if %10 {
      %c0_9 = arith.constant 0 : index
      %c0_10 = arith.constant 0 : index
      %11 = vector.load %arg7[%c0_9, %c0_10] : memref<8x128xf32, #tpu.memory_space<vmem>>, vector<8x128xf32>
      %cst = arith.constant dense<0.000000e+00> : vector<8xf32>
      %12 = vector.multi_reduction <add>, %11, %cst [1] : vector<8x128xf32> to vector<8xf32>
      %13 = vector.shape_cast %12 : vector<8xf32> to vector<8x1xf32>
      %cst_11 = arith.constant 1.562500e-02 : f32
      %14 = vector.broadcast %cst_11 : f32 to vector<8x1xf32>
      %15 = arith.mulf %13, %14 : vector<8x1xf32>
      %c0_12 = arith.constant 0 : index
      %c0_13 = arith.constant 0 : index
      %16 = vector.load %arg3[%c0_12, %c0_13] : memref<8x512xf32, #tpu.memory_space<vmem>>, vector<8x512xf32>
      %17 = vector.broadcast %15 : vector<8x1xf32> to vector<8x512xf32>
      %18 = arith.mulf %16, %17 : vector<8x512xf32>
      %cst_14 = arith.constant dense<0.000000e+00> : vector<512xf32>
      %19 = vector.multi_reduction <add>, %18, %cst_14 [0] : vector<8x512xf32> to vector<512xf32>
      %20 = vector.shape_cast %19 : vector<512xf32> to vector<1x512xf32>
      %c0_15 = arith.constant 0 : index
      %c0_16 = arith.constant 0 : index
      %c0_17 = arith.constant 0 : index
      %21 = vector.load %arg4[%c0_15, %c0_16, %c0_17] : memref<1x1x512xf32, #tpu.memory_space<vmem>>, vector<1x1x512xf32>
      %22 = vector.shape_cast %21 : vector<1x1x512xf32> to vector<1x512xf32>
      %23 = arith.mulf %22, %20 : vector<1x512xf32>
      %c0_18 = arith.constant 0 : index
      %c0_19 = arith.constant 0 : index
      %c0_20 = arith.constant 0 : index
      %24 = vector.load %arg5[%c0_18, %c0_19, %c0_20] : memref<1x1x512xf32, #tpu.memory_space<vmem>>, vector<1x1x512xf32>
      %25 = vector.shape_cast %24 : vector<1x1x512xf32> to vector<1x512xf32>
      %26 = arith.addf %23, %25 : vector<1x512xf32>
      %c0_21 = arith.constant 0 : index
      %c0_22 = arith.constant 0 : index
      %c0_23 = arith.constant 0 : index
      %27 = vector.load %arg6[%c0_21, %c0_22, %c0_23] : memref<1x1x512xf32, #tpu.memory_space<vmem>>, vector<1x1x512xf32>
      %28 = vector.shape_cast %27 : vector<1x1x512xf32> to vector<1x512xf32>
      %29 = vector.shape_cast %26 : vector<1x512xf32> to vector<1x1x512xf32>
      tpu.vector_store %arg6[%c0_21, %c0_22, %c0_23], %29 {strides = array<i32>} : memref<1x1x512xf32, #tpu.memory_space<vmem>>, vector<1x1x512xf32>,
    } else {
    }
    return
  }
  func.func @transform_0(%arg0: i32, %arg1: i32) -> (i32, i32, i32) {
    %c0_i32 = arith.constant 0 : i32
    %c0_i32_0 = arith.constant 0 : i32
    return %arg0, %c0_i32, %arg1 : i32, i32, i32
  }
  func.func @transform_1(%arg0: i32, %arg1: i32) -> (i32, i32) {
    %c0_i32 = arith.constant 0 : i32
    %c0_i32_0 = arith.constant 0 : i32
    %c0_i32_1 = arith.constant 0 : i32
    return %c0_i32, %c0_i32_0 : i32, i32
  }
  func.func @transform_2(%arg0: i32, %arg1: i32) -> (i32, i32, i32) {
    %c0_i32 = arith.constant 0 : i32
    %c0_i32_0 = arith.constant 0 : i32
    %c0_i32_1 = arith.constant 0 : i32
    return %arg0, %c0_i32, %c0_i32_0 : i32, i32, i32
  }
  func.func @transform_3(%arg0: i32, %arg1: i32) -> (i32, i32, i32) {
    %c0_i32 = arith.constant 0 : i32
    %c0_i32_0 = arith.constant 0 : i32
    %c0_i32_1 = arith.constant 0 : i32
    return %arg0, %c0_i32, %c0_i32_0 : i32, i32, i32
  }
  func.func @transform_4(%arg0: i32, %arg1: i32) -> (i32, i32, i32) {
    %c0_i32 = arith.constant 0 : i32
    %c0_i32_0 = arith.constant 0 : i32
    %c0_i32_1 = arith.constant 0 : i32
    return %arg0, %c0_i32, %c0_i32_0 : i32, i32, i32
  }
}

</mosaic_0001>

<bundles_post_ra>
// kernel: tpu_custom_call.1
= control target key start
LH: loop header
LB: loop body
LE: loop exit
PB: predicated region body
PF: predicated region fallthrough
CT: control target
= control target key end

     0   :  { %s1092_s0 = inlined_call_operand.hbm [shape: f32[2,8,128], index: 0, kind: input, shape index: {}]   ;;  %s1093_s1 = inlined_call_operand.hbm [shape: f32[8,512], index: 1, kind: input, shape index: {}]   ;;  %s1094_s2 = inlined_call_operand.hbm [shape: f32[2,1,512], index: 2, kind: input, shape index: {}]   ;;  %s1095_s3 = inlined_call_operand.vmem [shape: f32[2,1,512], index: 3, kind: input, shape index: {}]   ;;  %s1096_s4 = inlined_call_operand.hbm [shape: f32[2,1,512], index: 4, kind: output, shape index: {}]  }
   0x1   :  { %1102 = sst [smem:[#allocation14_spill]] %s1092_s0 }
   0x2   :  { %1103 = sst [smem:[#allocation15_spill]] %s1094_s2 }
   0x3   :  { %9 = vsyncpa [#allocation4], 0 }
   0x4   :  { %11 = vsyncpa [#allocation4 + $0x1], 0 }
   0x5   :  { %12 = vsyncpa [#allocation7], 0 }
   0x6   :  { %13 = vsyncpa [#allocation5], 0 }
   0x7   :  { %15 = vsyncpa [#allocation5 + $0x1], 0  ;;  %s827_s15 = smov 0   ;;  %s829_s16 = smov 0  }
   0x8   :  { %s831_s17 = smov 0   ;;  %s833_s18 = smov 0  }
   0x9   :  { %s835_s19 = smov 0   ;;  %s837_s20 = smov 0  }
   0xa LB: > { %s33_s21 = sadd.s32 1, %s791_s19  ;;  %s42_s22 = sadd.s32 1, %s783_s17  ;;  %s795_s20 = sphi %s837_s20, %s21_s20   ;;  %s791_s19 = sphi %s835_s19, %s1124_s19   ;;  %s787_s18 = sphi %s833_s18, %s1123_s18   ;;  %s783_s17 = sphi %s831_s17, %s1122_s17   ;;  %s779_s16 = sphi %s829_s16, %s1121_s16   ;;  %s775_s15 = sphi %s827_s15, %s1120_s15  }
   0xb   : > { %p35_p0 = scmp.ge.s32.totalorder %s33_s21, 2  ;;  %p49_p1 = scmp.ne.s32.totalorder %s783_s17, %s779_s16 }
   0xc   : > { %p50_p2 = scmp.eq.s32.totalorder %s795_s20, 0  ;;  %p564_p5 = scmp.lt.s32.totalorder %s795_s20, 2 }
   0xd   : > { %s1126_s21 = smov (%p35_p0, %s33_s21), 0  ;;  %s189_s24 = sand.u32 1, %s795_s20  }
   0xe   : > { %p51_p4 = por %p50_p2, %p49_p1  ;;  %s37_s23 = ssub.s32 %s791_s19, %s1126_s21 }
   0xf   : > { %p40_p6 = scmp.eq.s32.totalorder %s37_s23, 0  ;;  %s191_s25 = sand.u32 1, %s783_s17  }
  0x10   : > { %s521_s26 = sshll.u32 %s791_s19, 7  ;;  %s520_s28 = sshll.u32 %s191_s25, 3 }
  0x11   : > { %s875_s27 = scalar_select %p40_p6, %s783_s17, %s42_s22  }
  0x12   : > { %s1104_s0 = sld [smem:[#allocation14_spill]]  ;;  %p882_p7 = pnand %p564_p5, %p51_p4 }
  0x13   : > { %s193_s7 = scalar_lea.vmem [#allocation3], %s520_s28  ;;  %s886_s9 = sshll.u32 %s191_s25, 2 }
  0x14   : > { %s201_s8 = sshll.u32 %s193_s7, 4  ;;  %s890_s10 = scalar_lea.sflag [#allocation4], %s189_s24  ;;  %s888_s8 = int_to_ptr.vmem [resolvable:$true] %s201_s8 }
  0x15   : > { %p619_p9 = pneg %p882_p7 }
  0x18   : > { %s880_s5 = scalar_lea.hbm %s1104_s0, %s521_s26  ;;  %s622_s14 = scalar_lea.hbm %s1104_s0, 256 }
  0x19   : > { %s617_s11 = scalar_lea.hbm %s880_s5, 128  ;;  %p623_p12 = scmp.lt.u32.totalorder %s880_s5, %s1104_s0 }
  0x1a   : > { %p618_p8 = scmp.ne.s32.totalorder %s880_s5, %s617_s11  ;;  %p624_p13 = scmp.lt.u32.totalorder %s622_s14, %s617_s11 }
  0x1b   : > { %p626_p2 = scmp.lt.u32.totalorder %s617_s11, %s880_s5 }
  0x1c   : > { %p620_p10 = pnand %p619_p9, %p618_p8  ;;  %p625_p0 = por %p624_p13, %p623_p12 }
  0x1e   : > { %p621_p11 = pneg %p620_p10  ;;  %p627_p4 = por %p626_p2, %p625_p0 }
  0x20   : > { %p628_p5 = pnand %p627_p4, %p621_p11 }
  0x22   : > { %631 = shalt.err (!%p628_p5)
}
  0x23   : > { %s632_s24 = scalar_lea.vmem %s888_s8, 128  ;;  %s797_s25 = smov [#allocation3]  }
  0x24   : > { %p633_p6 = scmp.ne.s32.totalorder %s888_s8, %s632_s24  ;;  %s637_s26 = sshll.u32 %s797_s25, 4  ;;  %s638_s26 = int_to_ptr.vmem [resolvable:$false] %s637_s26 }
  0x25   : > { %s639_s28 = scalar_lea.vmem %s638_s26, 256  ;;  %p640_p3 = scmp.lt.s32.totalorder %s888_s8, %s638_s26 }
  0x26   : > { %p635_p8 = pnand %p633_p6, %p619_p9  ;;  %p641_p12 = scmp.lt.s32.totalorder %s639_s28, %s632_s24 }
  0x28   : > { %p636_p10 = pneg %p635_p8  ;;  %p642_p13 = por %p641_p12, %p640_p3 }
  0x2a   : > { %p643_p0 = pnand %p642_p13, %p636_p10 }
  0x2c   : > { %646 = shalt.err (!%p643_p0)
}
  0x2d   : > { %555 = dma.hbm_to_vmem [thread:$0]  (!%p882_p7), %s880_s5, 128, %s888_s8, %s890_s10  }
  0x2e   : > { %s919_s29 = sadd.s32 4294967295, %s795_s20   ;;  %s516_s30 = sadd.s32 4294967294, %s795_s20  }
  0x2f   : > { %p55_p3 = scmp.ne.s32.totalorder %s779_s16, %s775_s15  ;;  %p1097_p11 = scmp.eq.s32.totalorder %s919_s29, 0 }
  0x30   : > { %p152_p2 = scmp.eq.s32.totalorder %s919_s29, 1  ;;  %p158_p4 = scmp.eq.s32.totalorder %s516_s30, 1 }
  0x31   : > { %p928_p5 = por %p1097_p11, %p55_p3  ;;  %p517_p6 = scmp.ge.s32.totalorder %s795_s20, 1 }
  0x32   : > { %p936_p8 = por %p152_p2, %p49_p1  ;;  %p940_p10 = por %p158_p4, %p55_p3 }
  0x33   : > { %s1106_s7 = scalar_select %p928_p5, 1, 0 }
  0x34   : > { %s1107_s5 = scalar_select %p936_p8, 1, 0 }
  0x35   : > { %s1108_s8 = scalar_select %p940_p10, 1, 0 }
  0x36   : > { %p165_p12 = scmp.lt.s32.totalorder %s795_s20, 3  ;;  %s798_s12 = smov [#allocation6]  }
  0x37   : > { %s178_s13 = sshll.u32 %s798_s12, 4  ;;  %s536_s14 = sshll.u32 %s791_s19, 6  ;;  %s957_s13 = int_to_ptr.vmem [resolvable:$true] %s178_s13 }
  0x38   : > { %p945_p13 = pnand %p517_p6, %p165_p12  ;;  %s1110_s2 = sld [smem:[#allocation15_spill]] }
  0x39   : > { %s212_s25 = scalar_lea.vmem [#allocation8], %s886_s9 }
  0x3a   : > { %s1109_s11 = scalar_select %p945_p13, 1, 0 }
  0x3b   : > { %p548_p0 = pneg %p945_p13  ;;  %s220_s26 = sshll.u32 %s212_s25, 4  ;;  %s221_s26 = int_to_ptr.vmem [resolvable:$true] %s220_s26 }
  0x3d   : > { %p962_p1 = pnand %p548_p0, %p1097_p11 }
  0x3e   : > { %s955_s24 = scalar_lea.hbm %s1110_s2, %s536_s14  ;;  %s652_s22 = scalar_lea.hbm %s1110_s2, 128 }
  0x3f   : > { %s1111_s28 = scalar_select %p962_p1, 1, 0 }
  0x40   : > { %s647_s30 = scalar_lea.hbm %s955_s24, 64  ;;  %p653_p6 = scmp.lt.u32.totalorder %s955_s24, %s1110_s2 }
  0x41   : > { %p648_p3 = scmp.ne.s32.totalorder %s955_s24, %s647_s30  ;;  %p654_p12 = scmp.lt.u32.totalorder %s652_s22, %s647_s30 }
  0x42   : > { %p656_p11 = scmp.lt.u32.totalorder %s647_s30, %s955_s24 }
  0x43   : > { %p650_p2 = pnand %p648_p3, %p619_p9  ;;  %p655_p0 = por %p654_p12, %p653_p6 }
  0x45   : > { %p651_p4 = pneg %p650_p2  ;;  %p657_p10 = por %p656_p11, %p655_p0 }
  0x47   : > { %p658_p8 = pnand %p657_p10, %p651_p4 }
  0x49   : > { %661 = shalt.err (!%p658_p8)
}
  0x4a   : > { %s662_s9 = scalar_lea.vmem %s221_s26, 64  ;;  %s799_s25 = smov [#allocation8]  }
  0x4b   : > { %p663_p5 = scmp.ne.s32.totalorder %s221_s26, %s662_s9  ;;  %s667_s12 = sshll.u32 %s799_s25, 4  ;;  %s668_s12 = int_to_ptr.vmem [resolvable:$false] %s667_s12 }
  0x4c   : > { %s669_s14 = scalar_lea.vmem %s668_s12, 128  ;;  %p670_p13 = scmp.lt.s32.totalorder %s221_s26, %s668_s12 }
  0x4d   : > { %p665_p3 = pnand %p663_p5, %p619_p9  ;;  %p671_p1 = scmp.lt.s32.totalorder %s669_s14, %s662_s9 }
  0x4f   : > { %p666_p2 = pneg %p665_p3  ;;  %p672_p6 = por %p671_p1, %p670_p13 }
  0x51   : > { %p673_p12 = pnand %p672_p6, %p666_p2 }
  0x53   : > { %676 = shalt.err (!%p673_p12)
}
  0x54   : > { %558 = dma.hbm_to_vmem [thread:$0]  (!%p882_p7), %s955_s24, 64, %s221_s26, %s890_s10  }
  0x55   : > { %s677_s22 = scalar_lea.hbm %s1093_s1, 512  ;;  %p1112_p11 = scmp.ne.s32.totalorder %s1111_s28, 0 }
  0x56   : > { %p678_p9 = scmp.ne.s32.totalorder %s1093_s1, %s677_s22  ;;  %p684_p13 = scmp.lt.u32.totalorder %s677_s22, %s1093_s1 }
  0x57   : > { %p679_p5 = pneg %p1112_p11 }
  0x59   : > { %p680_p8 = pnand %p679_p5, %p678_p9 }
  0x5b   : > { %p681_p10 = pneg %p680_p8 }
  0x5d   : > { %p686_p1 = pnand %p684_p13, %p681_p10 }
  0x5f   : > { %689 = shalt.err (!%p686_p1)
}
  0x60   : > { %s690_s6 = scalar_lea.vmem %s957_s13, 512  ;;  %p698_p3 = scmp.lt.s32.totalorder %s957_s13, %s957_s13 }
  0x61   : > { %p691_p7 = scmp.ne.s32.totalorder %s957_s13, %s690_s6  ;;  %p699_p2 = scmp.lt.s32.totalorder %s690_s6, %s690_s6 }
  0x63   : > { %p693_p4 = pnand %p691_p7, %p679_p5  ;;  %p700_p6 = por %p699_p2, %p698_p3 }
  0x65   : > { %p694_p0 = pneg %p693_p4 }
  0x67   : > { %p701_p12 = pnand %p700_p6, %p694_p0 }
  0x69   : > { %704 = shalt.err (!%p701_p12)
}
  0x6a   : > { %551 = dma.hbm_to_vmem [thread:$0]  (!%p1112_p11), %s1093_s1, 512, %s957_s13, [#allocation7]  }
  0x6b   : > { %p1113_p9 = scmp.ne.s32.totalorder %s1109_s11, 0 }
  0x6c   : > { %s238_s24 = sand.u32 (!%p1113_p9), 1, %s919_s29   ;;  %s1011_s26 = sand.u32 (!%p1113_p9), 1, %s779_s16  }
  0x6d   : > { %236 = sbr.rel (%p1113_p9) target bundleno = 308 (0x134), region = 36  ;;  %s526_s12 = sshll.u32 (!%p1113_p9), %s1011_s26, 3 }
  0x6e   : > { %s239_s14 = scalar_lea.sflag (!%p1113_p9), [#allocation4], %s238_s24  ;;  %s242_s0 = scalar_lea.vmem (!%p1113_p9), [#allocation3], %s526_s12 }
  0x6f   : > { %p1114_p5 = scmp.ne.s32.totalorder (!%p1113_p9), %s1106_s7, 0 }
  0x74   : > { %758 = dma.done.wait (%p1114_p5), %s239_s14, 128  }
  0x75   : > { %760 = vsyncadd (%p1114_p5), %s239_s14, 4294967168  ;;  %p1115_p11 = scmp.eq.s32.totalorder %s919_s29, 0 }
  0x77   : > { %762 = dma.done.wait (%p1115_p11), [#allocation7], 512   ;;  %p1116_p8 = pmov %p1115_p11 }
  0x78   : > { %s528_s11 = sshll.u32 %s1011_s26, 2 }
  0x79   : > { %764 = vsyncadd (%p1116_p8), [#allocation7], 4294966784  ;;  %s1025_s13 = scalar_lea.vmem [#allocation8], %s528_s11 }
  0x7a   : > { %766 = dma.done.wait (%p1114_p5), %s239_s14, 64  }
  0x7b   : > { %768 = vsyncadd (%p1114_p5), %s239_s14, 4294967232  ;;  %v299_v0 = vld [vmem:[%s242_s0] sm:$0xff]  ;;  %v309_v1 = vld [vmem:[#allocation6] sm:$0xff]  ;;  %v800_v15 = vmov 1966171168   ;;  %v351_v17 = vlaneseq  ;;  %p289_p10 = scmp.lt.s32.totalorder %s787_s18, 1 }
  0x7c   : > { %306 = vadd.xlane.f32.xlu0 %v299_v0  ;;  %v310_v3 = vld [vmem:[#allocation6 + $0x8] sm:$0xff]  ;;  %v311_v4 = vld [vmem:[#allocation6 + $0x10] sm:$0xff]  ;;  %v312_v5 = vld [vmem:[#allocation6 + $0x18] sm:$0xff]  ;;  %v349_v16 = vunpack.c.l.s4 %v800_v15  ;;  %s537_s23 = sshll.u32 %s787_s18, 6  ;;  %s288_s9 = scalar_lea.vmem [#allocation9], %s528_s11 }
  0x7d   : > { %v352_v27 = vshrl.u32 %v351_v17, 7  ;;  %s290_s29 = scalar_select %p289_p10, %s787_s18, 1  ;;  %v341_v46 = vld [vmem:[%s1025_s13] sm:$0xf]  ;;  %vm376_vm0 = vcmp.lt.s32.totalorder %v351_v17, 512 }
  0x7e   : > { %v350_v26 = vunpack.c.0.s8 %v349_v16  ;;  %s394_s25 = sshll.u32 %s288_s9, 4  ;;  %s1043_s10 = scalar_lea.hbm %s1096_s4, %s537_s23  ;;  %s1045_s25 = int_to_ptr.vmem [resolvable:$true] %s394_s25 }
  0x7f   : > { %s530_s7 = sshll.u32 %s290_s29, 2  ;;  %s380_s24 = scalar_lea.sflag [#allocation5], %s1011_s26 }
  0x80   : > { %v353_v36 = vsub.s32 %v350_v26, %v352_v27  ;;  %s292_s22 = scalar_lea.vmem %s1095_s3, %s530_s7  ;;  %s705_s12 = scalar_lea.vmem %s1045_s25, 64 }
  0x81   : > { %v372_v48 = vld [vmem:[%s292_s22] sm:$0xf]  ;;  %p706_p13 = scmp.ne.s32.totalorder %s1045_s25, %s705_s12  ;;  %p1117_p1 = scmp.ne.s32.totalorder %s1107_s5, 0 }
  0x82   : > { %s801_s18 = smov [#allocation9]  }
  0x83   : > { %p707_p7 = pnand %p706_p13, %p1117_p1  ;;  %s709_s14 = sshll.u32 %s801_s18, 4  ;;  %s710_s14 = int_to_ptr.vmem [resolvable:$false] %s709_s14 }
  0x84   : > { %s711_s0 = scalar_lea.vmem %s710_s14, 128  ;;  %p712_p0 = scmp.lt.s32.totalorder %s1045_s25, %s710_s14 }
  0x85   : > { %p708_p4 = pneg %p707_p7  ;;  %p713_p3 = scmp.lt.s32.totalorder %s711_s0, %s705_s12 }
  0x87   : > { %p714_p2 = por %p713_p3, %p712_p0 }
  0x89   : > { %p715_p6 = pnand %p714_p2, %p708_p4 }
 0x109   : > { %v307_v2 = vpop.xlane.xlu0 %306 }
 0x10a   : > { %v308_v6 = vmul.f32 0.015625, %v307_v2 }
 0x10c   : > { %v313_v7 = vmul.f32 %v309_v1, %v308_v6  ;;  %v314_v8 = vmul.f32 %v310_v3, %v308_v6  ;;  %v315_v9 = vmul.f32 %v311_v4, %v308_v6  ;;  %v316_v10 = vmul.f32 %v312_v5, %v308_v6 }
 0x10e   : > { %v317_v11 = vrot.slane %v313_v7, 4  ;;  %v323_v12 = vrot.slane %v314_v8, 4  ;;  %v329_v13 = vrot.slane %v315_v9, 4  ;;  %v335_v14 = vrot.slane %v316_v10, 4 }
 0x110   : > { %v318_v18 = vadd.f32 %v317_v11, %v313_v7  ;;  %v324_v19 = vadd.f32 %v323_v12, %v314_v8  ;;  %v330_v20 = vadd.f32 %v329_v13, %v315_v9  ;;  %v336_v21 = vadd.f32 %v335_v14, %v316_v10 }
 0x112   : > { %v319_v22 = vrot.slane %v318_v18, 2  ;;  %v325_v23 = vrot.slane %v324_v19, 2  ;;  %v331_v24 = vrot.slane %v330_v20, 2  ;;  %v337_v25 = vrot.slane %v336_v21, 2 }
 0x114   : > { %v320_v28 = vadd.f32 %v319_v22, %v318_v18  ;;  %v326_v29 = vadd.f32 %v325_v23, %v324_v19  ;;  %v332_v30 = vadd.f32 %v331_v24, %v330_v20  ;;  %v338_v31 = vadd.f32 %v337_v25, %v336_v21 }
 0x116   : > { %v321_v32 = vrot.slane %v320_v28, 1  ;;  %v327_v33 = vrot.slane %v326_v29, 1  ;;  %v333_v34 = vrot.slane %v332_v30, 1  ;;  %v339_v35 = vrot.slane %v338_v31, 1 }
 0x118   : > { %v322_v37 = vadd.f32 %v321_v32, %v320_v28  ;;  %v328_v38 = vadd.f32 %v327_v33, %v326_v29  ;;  %v334_v39 = vadd.f32 %v333_v34, %v332_v30  ;;  %v340_v40 = vadd.f32 %v339_v35, %v338_v31 }
 0x11a   : > { %v346_v41 = vcombine.low %v322_v37, %v328_v38  ;;  %v347_v42 = vcombine.low %v334_v39, %v340_v40 }
 0x11c   : > { %v354_v43 = vrot.slane %v346_v41, %v353_v36  ;;  %v361_v44 = vrot.slane %v347_v42, %v353_v36 }
 0x11e   : > { %v362_v45 = vcombine.low %v354_v43, %v361_v44 }
 0x120   : > { %v369_v47 = vrot.slane %v362_v45, %v353_v36 }
 0x122   : > { %v371_v49 = vmul.f32 %v369_v47, %v341_v46 }
 0x124   : > { %v373_v50 = vadd.f32 %v372_v48, %v371_v49 }
 0x126   : > { %378 = vst.msk [vmem:[%s288_s9] sm:$0xf] %vm376_vm0, %v373_v50 }
 0x127   : > { %718 = shalt.err (!%p715_p6)
}
 0x128   : > { %s719_s26 = scalar_lea.hbm %s1043_s10, 64  ;;  %s723_s29 = scalar_lea.hbm %s1096_s4, 128 }
 0x129   : > { %p720_p12 = scmp.ne.s32.totalorder %s1043_s10, %s719_s26  ;;  %p724_p11 = scmp.lt.u32.totalorder %s1043_s10, %s1096_s4 }
 0x12a   : > { %p725_p8 = scmp.lt.u32.totalorder %s723_s29, %s719_s26  ;;  %p727_p13 = scmp.lt.u32.totalorder %s719_s26, %s1043_s10 }
 0x12b   : > { %p721_p9 = pnand %p720_p12, %p1117_p1 }
 0x12c   : > { %p726_p10 = por %p725_p8, %p724_p11 }
 0x12d   : > { %p722_p5 = pneg %p721_p9 }
 0x12e   : > { %p728_p7 = por %p727_p13, %p726_p10 }
 0x130   : > { %p729_p4 = pnand %p728_p7, %p722_p5 }
 0x132   : > { %732 = shalt.err (!%p729_p4)
}
 0x133   : > { %546 = dma.vmem_to_hbm [thread:$0]  (%p1117_p1), %s1045_s25, 64, %s1043_s10, %s380_s24  }
 0x134 PF: > { %s406_s30 = sand.u32 1, %s775_s15   ;;  %p1118_p0 = scmp.ne.s32.totalorder %s1108_s8, 0 }
 0x135   : > { %p1119_p3 = scmp.ge.s32.totalorder %s795_s20, 2  ;;  %s407_s22 = scalar_lea.sflag [#allocation5], %s406_s30 }
 0x137   : > { %p560_p2 = pnand %p1119_p3, %p1118_p0 }
 0x139   : > { %770 = dma.done.wait (!%p560_p2), %s407_s22, 64  }
 0x13a   : > { %772 = vsyncadd (!%p560_p2), %s407_s22, 4294967232  ;;  %s21_s20 = sadd.s32 1, %s795_s20   ;;  %s1120_s15 = smov %s779_s16 }
 0x13b   : > { %p18_p6 = scmp.ge.s32.totalorder %s21_s20, 4   ;;  %s1121_s16 = smov %s783_s17 }
 0x13c   : > { %s1122_s17 = smov %s875_s27  ;;  %s1123_s18 = smov %s791_s19 }
 0x13d   : > { %s1124_s19 = smov %s1126_s21  ;;  %20 = sbr.rel (!%p18_p6) target bundleno = 10 (0xa), region = 107 }
 0x144   :  { %412 = vsyncpa [#allocation4], 1 }
 0x145   :  { %414 = vsyncpa [#allocation4 + $0x1], 1 }
 0x146   :  { %415 = vsyncpa [#allocation7], 1 }
 0x147   :  { %416 = vsyncpa [#allocation5], 1 }
 0x148   :  { %418 = vsyncpa [#allocation5 + $0x1], 1 }

</bundles_post_ra>
